<compile_context>
chip_gen: v5e
topology: v5e:2x2
jax: 0.10.0
libtpu: 0.0.40
codegen_flags: <defaults>
</compile_context>

<pallas_src>
import functools

import jax
import jax.numpy as jnp
from jax.experimental import pallas as pl
from jax.experimental.pallas import tpu as pltpu


PACK = 8            # batch elements packed per row -> hidden width PACK*16 = 128 lanes
_CHUNK_ROWS = 128   # packed rows (= 1024 batch elements) processed per inner-loop chunk
_HIDDEN = 16        # fixed by the PyTorch module


def _round_up(x, m):
    return (x + m - 1) // m * m


# ---------------------------------------------------------------------------
# Kernel
# ---------------------------------------------------------------------------
def _critic_kernel(x_ref, w1_ref, b1_ref, w2_ref, b2_ref, w3_ref, b3_ref, o_ref,
                   *, chunk_rows, n_chunks):
    """One batch tile.

    x_ref : (tile_rows, PACK*state_dim)  packed input rows (8 batch elems / row)
    w*_ref: block-diagonal packed weights (lane-dense, VMEM-resident)
    o_ref : (tile_rows, PACK)            packed values (8 batch elems / row)
    """

    @pl.loop(0, n_chunks)
    def _chunk(c):
        off = pl.multiple_of(c * chunk_rows, chunk_rows)
        x_c = x_ref[pl.ds(off, chunk_rows), :]                    # (chunk, 8*sd)
        # All three layers are lane-dense MXU matmuls; biases broadcast over rows.
        h1 = jnp.maximum(
            jnp.dot(x_c, w1_ref[...], preferred_element_type=jnp.float32) + b1_ref[...],
            0.0)                                                  # (chunk, 128)
        h2 = jnp.maximum(
            jnp.dot(h1, w2_ref[...], preferred_element_type=jnp.float32) + b2_ref[...],
            0.0)                                                  # (chunk, 128)
        v = jnp.dot(h2, w3_ref[...], preferred_element_type=jnp.float32) + b3_ref[...]
        o_ref[pl.ds(off, chunk_rows), :] = v.astype(o_ref.dtype)  # (chunk, PACK)


# ---------------------------------------------------------------------------
# Wrapper
# ---------------------------------------------------------------------------
def _pack_params(params):
    """Build block-diagonal weights so 8 batch elements ride one packed row."""
    f32 = jnp.float32
    eye = jnp.eye(PACK, dtype=f32)
    w1p = jnp.kron(eye, params["w1"].T.astype(f32))   # (PACK*sd, PACK*16) = (8sd, 128)
    w2p = jnp.kron(eye, params["w2"].T.astype(f32))   # (128, 128)
    w3p = jnp.kron(eye, params["w3"].T.astype(f32))   # (128, PACK)
    b1p = jnp.tile(params["b1"].reshape(1, -1).astype(f32), (1, PACK))   # (1, 128)
    b2p = jnp.tile(params["b2"].reshape(1, -1).astype(f32), (1, PACK))   # (1, 128)
    b3p = jnp.tile(params["b3"].reshape(1, -1).astype(f32), (1, PACK))   # (1, PACK)
    return w1p, b1p, w2p, b2p, w3p, b3p


def _choose_tiling(rows, tile_batch):
    """Pick (tile_rows, chunk_rows); tile_rows is a multiple of 8 and of chunk_rows."""
    tile_rows = _round_up(max(1, tile_batch // PACK), 8)
    # v7x has 2 TensorCores: keep >= 2 grid steps on the "parallel" axis when
    # there is enough work, so both cores get tiles.
    if rows >= 2 * _CHUNK_ROWS:
        tile_rows = min(tile_rows, _round_up(pl.cdiv(rows, 2), _CHUNK_ROWS))
    tile_rows = min(tile_rows, _round_up(rows, 8))
    chunk_rows = min(_CHUNK_ROWS, tile_rows)
    tile_rows = _round_up(tile_rows, chunk_rows)
    return tile_rows, chunk_rows


def a2c_critic_forward_pallas(state, params, *, tile_batch=32768):
    """state: (B, state_dim) float32 -> value (B, 1) float32."""
    B, state_dim = state.shape

    # Only pad B to a multiple of PACK (8), and only when needed (no tile-multiple pad).
    b_pad = _round_up(B, PACK)
    if b_pad != B:
        state = jnp.pad(state, ((0, b_pad - B), (0, 0)))
    rows = b_pad // PACK

    # Free, contiguous reshape: NO transpose, no extra HBM pass.
    xp = state.astype(jnp.float32).reshape(rows, PACK * state_dim)
    w1p, b1p, w2p, b2p, w3p, b3p = _pack_params(params)

    tile_rows, chunk_rows = _choose_tiling(rows, tile_batch)
    n_tiles = pl.cdiv(rows, tile_rows)
    n_chunks = tile_rows // chunk_rows

    hidden = PACK * _HIDDEN
    param_bytes = sum(int(p.size) * 4 for p in (w1p, b1p, w2p, b2p, w3p, b3p))
    cost = pl.CostEstimate(
        flops=2 * rows * (PACK * state_dim * hidden + hidden * hidden + hidden * PACK),
        transcendentals=0,
        bytes_accessed=rows * (PACK * state_dim + PACK) * 4 + param_bytes,
    )

    const = lambda i: (0, 0)   # grid-invariant: weights stay resident in VMEM
    out = pl.pallas_call(
        functools.partial(_critic_kernel, chunk_rows=chunk_rows, n_chunks=n_chunks),
        out_shape=jax.ShapeDtypeStruct((rows, PACK), jnp.float32),
        grid_spec=pltpu.PrefetchScalarGridSpec(
            num_scalar_prefetch=0,
            grid=(n_tiles,),
            in_specs=[
                pl.BlockSpec((tile_rows, PACK * state_dim), lambda i: (i, 0)),
                pl.BlockSpec(w1p.shape, const),
                pl.BlockSpec(b1p.shape, const),
                pl.BlockSpec(w2p.shape, const),
                pl.BlockSpec(b2p.shape, const),
                pl.BlockSpec(w3p.shape, const),
                pl.BlockSpec(b3p.shape, const),
            ],
            out_specs=pl.BlockSpec((tile_rows, PACK), lambda i: (i, 0)),
        ),
        compiler_params=pltpu.CompilerParams(
            dimension_semantics=("parallel",),         # shard batch tiles across TCs (v7x)
            vmem_limit_bytes=32 * 1024 * 1024,         # explicit; v7x(64 MiB)-safe
        ),
        cost_estimate=cost,
    )(xp, w1p, b1p, w2p, b2p, w3p, b3p)

    # (rows, PACK) row-major == flat batch order -> free reshape, then drop the pad.
    return out.reshape(b_pad, 1)[:B]


def reference_forward(state, params):
    """Pure-JAX/XLA reference of the same forward pass (PyTorch weight layout)."""
    h1 = jnp.maximum(state @ params["w1"].T + params["b1"], 0.0)
    h2 = jnp.maximum(h1 @ params["w2"].T + params["b2"], 0.0)
    return h2 @ params["w3"].T + params["b3"]


def a2c_critic_forward(state, params, *, min_pallas_batch=512):
    """Tiny batches are pure launch overhead -> fused XLA path; otherwise Pallas."""
    if state.shape[0] < min_pallas_batch:
        return reference_forward(state, params)
    return a2c_critic_forward_pallas(state, params)


def init_params(key, state_dim):
    """Deterministic init mirroring nn.Linear (weights in PyTorch (out, in) layout)."""
    ks = jax.random.split(key, 6)

    def uniform_like_torch(k, fan_in, shape):
        bound = 1.0 / jnp.sqrt(fan_in)
        return jax.random.uniform(k, shape, jnp.float32, -bound, bound)

    return {
        "w1": uniform_like_torch(ks[0], state_dim, (16, state_dim)),
        "b1": uniform_like_torch(ks[1], state_dim, (16,)),
        "w2": uniform_like_torch(ks[2], 16, (16, 16)),
        "b2": uniform_like_torch(ks[3], 16, (16,)),
        "w3": uniform_like_torch(ks[4], 16, (1, 16)),
        "b3": uniform_like_torch(ks[5], 16, (1,)),
    }


if __name__ == "__main__":
    key = jax.random.PRNGKey(0)
    k_params, k_state = jax.random.split(key)

    state_dim = 4                       # CartPole-style observation
    params = init_params(k_params, state_dim)

    # Tolerance sized to stay robust across MXU f32 accumulation configurations.
    ATOL = RTOL = 2e-3

    # 1) Small batch: single (ragged) tile, single chunk.
    state_small = jax.random.normal(k_state, (8, state_dim), jnp.float32)
    v_small = jax.block_until_ready(a2c_critic_forward_pallas(state_small, params))
    assert v_small.shape == (8, 1)
    assert jnp.allclose(v_small, reference_forward(state_small, params), atol=ATOL, rtol=RTOL)

    # 2) Non-multiple-of-8 batch forced onto 2 grid tiles (exercises pad + ragged tail).
    state_med = jax.random.normal(k_state, (1001, state_dim), jnp.float32)
    v_med = jax.block_until_ready(
        a2c_critic_forward_pallas(state_med, params, tile_batch=512))
    assert v_med.shape == (1001, 1)
    assert jnp.allclose(v_med, reference_forward(state_med, params), atol=ATOL, rtol=RTOL)

    # 3) Rollout-sized batch: 2 "parallel" tiles x 4 in-kernel chunks each.
    state_big = jax.random.normal(k_state, (8192, state_dim), jnp.float32)
    v_big = jax.block_until_ready(a2c_critic_forward(state_big, params))
    assert v_big.shape == (8192, 1)
    assert jnp.allclose(v_big, reference_forward(state_big, params), atol=ATOL, rtol=RTOL)

    print("KERNEL_OK")
</pallas_src>

<mosaic_0001>
module attributes {stable_mosaic.version = 11 : i64} {
  func.func @_critic_kernel(%arg0: i32, %arg1: memref<8x32xf32, #tpu.memory_space<vmem>>, %arg2: memref<32x128xf32, #tpu.memory_space<vmem>>, %arg3: memref<1x128xf32, #tpu.memory_space<vmem>>, %arg4: memref<128x128xf32, #tpu.memory_space<vmem>>, %arg5: memref<1x128xf32, #tpu.memory_space<vmem>>, %arg6: memref<128x8xf32, #tpu.memory_space<vmem>>, %arg7: memref<1x8xf32, #tpu.memory_space<vmem>>, %arg8: memref<8x8xf32, #tpu.memory_space<vmem>>) attributes {dimension_semantics = [#tpu.dimension_semantics<parallel>], iteration_bounds = array<i64: 1>, scalar_prefetch = 0 : i64, scratch_operands = 0 : i64, tpu.core_type = #tpu.core_type<tc>, window_params = [{transform_indices = @transform_0, window_bounds = array<i64: 8, 32>}, {pipeline_mode = #tpu.pipeline_mode<synchronous>, transform_indices = @transform_1, window_bounds = array<i64: 32, 128>}, {pipeline_mode = #tpu.pipeline_mode<synchronous>, transform_indices = @transform_2, window_bounds = array<i64: 1, 128>}, {pipeline_mode = #tpu.pipeline_mode<synchronous>, transform_indices = @transform_3, window_bounds = array<i64: 128, 128>}, {pipeline_mode = #tpu.pipeline_mode<synchronous>, transform_indices = @transform_4, window_bounds = array<i64: 1, 128>}, {pipeline_mode = #tpu.pipeline_mode<synchronous>, transform_indices = @transform_5, window_bounds = array<i64: 128, 8>}, {pipeline_mode = #tpu.pipeline_mode<synchronous>, transform_indices = @transform_6, window_bounds = array<i64: 1, 8>}, {transform_indices = @transform_7, window_bounds = array<i64: 8, 8>}]} {
    %c0_i32 = arith.constant 0 : i32
    %c1_i32 = arith.constant 1 : i32
    %0 = arith.muli %c0_i32, %c1_i32 : i32
    %c0_i32_0 = arith.constant 0 : i32
    %1 = arith.addi %c0_i32_0, %0 : i32
    %c8_i32 = arith.constant 8 : i32
    %2 = arith.muli %1, %c8_i32 : i32
    %3 = tpu.assume_multiple %2, 8 : i32
    %4 = arith.index_cast %3 : i32 to index
    %c0 = arith.constant 0 : index
    %5 = vector.load %arg1[%4, %c0] : memref<8x32xf32, #tpu.memory_space<vmem>>, vector<8x32xf32>
    %c0_1 = arith.constant 0 : index
    %c0_2 = arith.constant 0 : index
    %6 = vector.load %arg2[%c0_1, %c0_2] : memref<32x128xf32, #tpu.memory_space<vmem>>, vector<32x128xf32>
    %cst = arith.constant dense<0.000000e+00> : vector<8x128xf32>
    %7 = tpu.matmul %5, %6, %cst {dimension_numbers = #tpu.dot_dimension_numbers<[1], [0], [0], [1], [0, 0, 1, 1], [], []>} : vector<8x32xf32>, vector<32x128xf32>, vector<8x128xf32> -> vector<8x128xf32>
    %c0_3 = arith.constant 0 : index
    %c0_4 = arith.constant 0 : index
    %8 = vector.load %arg3[%c0_3, %c0_4] : memref<1x128xf32, #tpu.memory_space<vmem>>, vector<1x128xf32>
    %9 = vector.broadcast %8 : vector<1x128xf32> to vector<8x128xf32>
    %10 = arith.addf %7, %9 : vector<8x128xf32>
    %cst_5 = arith.constant 0.000000e+00 : f32
    %11 = vector.broadcast %cst_5 : f32 to vector<8x128xf32>
    %12 = arith.maximumf %10, %11 : vector<8x128xf32>
    %c0_6 = arith.constant 0 : index
    %c0_7 = arith.constant 0 : index
    %13 = vector.load %arg4[%c0_6, %c0_7] : memref<128x128xf32, #tpu.memory_space<vmem>>, vector<128x128xf32>
    %cst_8 = arith.constant dense<0.000000e+00> : vector<8x128xf32>
    %14 = tpu.matmul %12, %13, %cst_8 {dimension_numbers = #tpu.dot_dimension_numbers<[1], [0], [0], [1], [0, 0, 1, 1], [], []>} : vector<8x128xf32>, vector<128x128xf32>, vector<8x128xf32> -> vector<8x128xf32>
    %c0_9 = arith.constant 0 : index
    %c0_10 = arith.constant 0 : index
    %15 = vector.load %arg5[%c0_9, %c0_10] : memref<1x128xf32, #tpu.memory_space<vmem>>, vector<1x128xf32>
    %16 = vector.broadcast %15 : vector<1x128xf32> to vector<8x128xf32>
    %17 = arith.addf %14, %16 : vector<8x128xf32>
    %cst_11 = arith.constant 0.000000e+00 : f32
    %18 = vector.broadcast %cst_11 : f32 to vector<8x128xf32>
    %19 = arith.maximumf %17, %18 : vector<8x128xf32>
    %c0_12 = arith.constant 0 : index
    %c0_13 = arith.constant 0 : index
    %20 = vector.load %arg6[%c0_12, %c0_13] : memref<128x8xf32, #tpu.memory_space<vmem>>, vector<128x8xf32>
    %cst_14 = arith.constant dense<0.000000e+00> : vector<8x8xf32>
    %21 = tpu.matmul %19, %20, %cst_14 {dimension_numbers = #tpu.dot_dimension_numbers<[1], [0], [0], [1], [0, 0, 1, 1], [], []>} : vector<8x128xf32>, vector<128x8xf32>, vector<8x8xf32> -> vector<8x8xf32>
    %c0_15 = arith.constant 0 : index
    %c0_16 = arith.constant 0 : index
    %22 = vector.load %arg7[%c0_15, %c0_16] : memref<1x8xf32, #tpu.memory_space<vmem>>, vector<1x8xf32>
    %23 = vector.broadcast %22 : vector<1x8xf32> to vector<8x8xf32>
    %24 = arith.addf %21, %23 : vector<8x8xf32>
    %25 = arith.index_cast %3 : i32 to index
    %c0_17 = arith.constant 0 : index
    %26 = vector.load %arg8[%25, %c0_17] : memref<8x8xf32, #tpu.memory_space<vmem>>, vector<8x8xf32>
    tpu.vector_store %arg8[%25, %c0_17], %24 {strides = array<i32>} : memref<8x8xf32, #tpu.memory_space<vmem>>, vector<8x8xf32>,
    %c1_i32_18 = arith.constant 1 : i32
    return
  }
  func.func @transform_0(%arg0: i32) -> (i32, i32) {
    %c0_i32 = arith.constant 0 : i32
    %c0_i32_0 = arith.constant 0 : i32
    return %arg0, %c0_i32 : i32, i32
  }
  func.func @transform_1(%arg0: i32) -> (i32, i32) {
    %c0_i32 = arith.constant 0 : i32
    %c0_i32_0 = arith.constant 0 : i32
    %c0_i32_1 = arith.constant 0 : i32
    return %c0_i32, %c0_i32_0 : i32, i32
  }
  func.func @transform_2(%arg0: i32) -> (i32, i32) {
    %c0_i32 = arith.constant 0 : i32
    %c0_i32_0 = arith.constant 0 : i32
    %c0_i32_1 = arith.constant 0 : i32
    return %c0_i32, %c0_i32_0 : i32, i32
  }
  func.func @transform_3(%arg0: i32) -> (i32, i32) {
    %c0_i32 = arith.constant 0 : i32
    %c0_i32_0 = arith.constant 0 : i32
    %c0_i32_1 = arith.constant 0 : i32
    return %c0_i32, %c0_i32_0 : i32, i32
  }
  func.func @transform_4(%arg0: i32) -> (i32, i32) {
    %c0_i32 = arith.constant 0 : i32
    %c0_i32_0 = arith.constant 0 : i32
    %c0_i32_1 = arith.constant 0 : i32
    return %c0_i32, %c0_i32_0 : i32, i32
  }
  func.func @transform_5(%arg0: i32) -> (i32, i32) {
    %c0_i32 = arith.constant 0 : i32
    %c0_i32_0 = arith.constant 0 : i32
    %c0_i32_1 = arith.constant 0 : i32
    return %c0_i32, %c0_i32_0 : i32, i32
  }
  func.func @transform_6(%arg0: i32) -> (i32, i32) {
    %c0_i32 = arith.constant 0 : i32
    %c0_i32_0 = arith.constant 0 : i32
    %c0_i32_1 = arith.constant 0 : i32
    return %c0_i32, %c0_i32_0 : i32, i32
  }
  func.func @transform_7(%arg0: i32) -> (i32, i32) {
    %c0_i32 = arith.constant 0 : i32
    %c0_i32_0 = arith.constant 0 : i32
    return %arg0, %c0_i32 : i32, i32
  }
}

</mosaic_0001>

<bundles_post_ra>
// kernel: tpu_custom_call.1
= control target key start
LH: loop header
LB: loop body
LE: loop exit
PB: predicated region body
PF: predicated region fallthrough
CT: control target
= control target key end

     0   :  { %12 = vsyncpa [#allocation3], 0  ;;  %s401_s0 = inlined_call_operand.vmem [shape: f32[1,32], index: 0, kind: input, shape index: {}]   ;;  %s402_s1 = inlined_call_operand.hbm [shape: f32[32,128], index: 1, kind: input, shape index: {}]   ;;  %s403_s2 = inlined_call_operand.vmem [shape: f32[1,128], index: 2, kind: input, shape index: {}]   ;;  %s404_s3 = inlined_call_operand.vmem [shape: f32[128,128], index: 3, kind: input, shape index: {}]   ;;  %s405_s4 = inlined_call_operand.vmem [shape: f32[1,128], index: 4, kind: input, shape index: {}]   ;;  %s406_s5 = inlined_call_operand.vmem [shape: f32[128,8], index: 5, kind: input, shape index: {}]   ;;  %s407_s6 = inlined_call_operand.vmem [shape: f32[1,8], index: 6, kind: input, shape index: {}]   ;;  %s408_s7 = inlined_call_operand.hbm [shape: f32[1,8], index: 7, kind: output, shape index: {}]  }
   0x1   :  { %13 = vsyncpa [#allocation4], 0  ;;  %s20_s26 = sshll.u32 %s402_s1, 4  ;;  %s241_s27 = smov [#allocation2]   ;;  %s21_s26 = int_to_ptr.hbm [resolvable:$true] %s20_s26 }
   0x2   :  { %s22_s28 = sshll.u32 %s241_s27, 4  ;;  %s242_s29 = smov 128   ;;  %s23_s28 = int_to_ptr.vmem [resolvable:$true] %s22_s28 }
   0x3   :  { %s243_s30 = smov 8  }
   0x4   :  { %28 = dma.hbm_to_vmem [thread:$0]  %s21_s26, 512, %s23_s28, [#allocation3], %s242_s29, %s242_s29, %s243_s30  }
   0x5   :  { %237 = dma.done.wait [#allocation3], 512  }
   0x6   :  { %238 = vsyncadd [#allocation3], 4294966784  ;;  %v47_v0 = vld [vmem:[#allocation2 + $0x18] sm:$0xff]  ;;  %v46_v1 = vld [vmem:[#allocation2 + $0x10] sm:$0xff]  ;;  %vm52_vm0 = vcmask 261120   ;;  %vm158_vm1 = vcmask 64512  }
   0x7   :  { %68 = vmatpush.msra.mxu0 %v47_v0  ;;  %v92_v2 = vld [vmem:[%s404_s3 + $0x78] sm:$0xff]  ;;  %v45_v3 = vld [vmem:[#allocation2 + $0x8] sm:$0xff]  ;;  %v91_v4 = vld [vmem:[%s404_s3 + $0x70] sm:$0xff] }
   0x8   :  { %97 = vmatpush.msra.mxu1 %v92_v2  ;;  %v90_v5 = vld [vmem:[%s404_s3 + $0x68] sm:$0xff]  ;;  %v44_v6 = vld [vmem:[#allocation2] sm:$0xff]  ;;  %v88_v9 = vld [vmem:[%s404_s3 + $0x58] sm:$0xff] }
   0x9   :  { %69 = vmatpush.msra.mxu0 %v46_v1  ;;  %v43_v7 = vld [vmem:[%s401_s0] sm:$0xff]  ;;  %v87_v10 = vld [vmem:[%s404_s3 + $0x50] sm:$0xff]  ;;  %v86_v11 = vld [vmem:[%s404_s3 + $0x48] sm:$0xff] }
   0xa   :  { %98 = vmatpush.msra.mxu1 %v91_v4  ;;  %v89_v8 = vld [vmem:[%s404_s3 + $0x60] sm:$0xff]  ;;  %v84_v13 = vld [vmem:[%s404_s3 + $0x38] sm:$0xff]  ;;  %v83_v14 = vld [vmem:[%s404_s3 + $0x30] sm:$0xff] }
   0xb   :  { %70 = vmatpush.msra.mxu0 %v45_v3  ;;  %v85_v12 = vld [vmem:[%s404_s3 + $0x40] sm:$0xff]  ;;  %v82_v15 = vld [vmem:[%s404_s3 + $0x28] sm:$0xff]  ;;  %v80_v17 = vld [vmem:[%s404_s3 + $0x18] sm:$0xff] }
   0xc   :  { %99 = vmatpush.msra.mxu1 %v90_v5  ;;  %v81_v16 = vld [vmem:[%s404_s3 + $0x20] sm:$0xff]  ;;  %v79_v18 = vld [vmem:[%s404_s3 + $0x10] sm:$0xff]  ;;  %v78_v19 = vld [vmem:[%s404_s3 + $0x8] sm:$0xff] }
   0xd   :  { %71 = vmatpush.msra.mxu0 %v44_v6  ;;  %v77_v20 = vld [vmem:[%s404_s3] sm:$0xff]  ;;  %v133_v21 = vld [vmem:[%s406_s5 + $0x78] sm:$0xff]  ;;  %v132_v22 = vld [vmem:[%s406_s5 + $0x70] sm:$0xff] }
   0xe   :  { %179 = vmatmul.msk.f32.vlgmr.msra.gmra.mxu0 %vm52_vm0, %v43_v7  ;;  %100 = vmatpush.msra.mxu1 %v89_v8  ;;  %v131_v23 = vld [vmem:[%s406_s5 + $0x68] sm:$0xff]  ;;  %v130_v24 = vld [vmem:[%s406_s5 + $0x60] sm:$0xff]  ;;  %v129_v25 = vld [vmem:[%s406_s5 + $0x58] sm:$0xff] }
   0xf   :  { %138 = vmatpush.msra.mxu2 %v133_v21  ;;  %v128_v26 = vld [vmem:[%s406_s5 + $0x50] sm:$0xff]  ;;  %v127_v27 = vld [vmem:[%s406_s5 + $0x48] sm:$0xff]  ;;  %v126_v28 = vld [vmem:[%s406_s5 + $0x40] sm:$0xff] }
  0x10   :  { %101 = vmatpush.msra.mxu1 %v88_v9  ;;  %v125_v29 = vld [vmem:[%s406_s5 + $0x38] sm:$0xff]  ;;  %v124_v30 = vld [vmem:[%s406_s5 + $0x30] sm:$0xff]  ;;  %v123_v31 = vld [vmem:[%s406_s5 + $0x28] sm:$0xff] }
  0x11   :  { %139 = vmatpush.msra.mxu2 %v132_v22  ;;  %v122_v32 = vld [vmem:[%s406_s5 + $0x20] sm:$0xff]  ;;  %v121_v33 = vld [vmem:[%s406_s5 + $0x18] sm:$0xff]  ;;  %v120_v38 = vld [vmem:[%s406_s5 + $0x10] sm:$0xff] }
  0x12   :  { %102 = vmatpush.msra.mxu1 %v87_v10  ;;  %v186_v34 = vld [vmem:[%s403_s2] ss:$0 sm:$0xff]  ;;  %v119_v39 = vld [vmem:[%s406_s5 + $0x8] sm:$0xff] }
  0x13   :  { %140 = vmatpush.msra.mxu2 %v131_v23  ;;  %v118_v40 = vld [vmem:[%s406_s5] sm:$0xff] }
  0x14   :  { %103 = vmatpush.msra.mxu1 %v86_v11  ;;  %v187_v41 = vld [vmem:[%s405_s4] ss:$0 sm:$0xff] }
  0x15   :  { %141 = vmatpush.msra.mxu2 %v130_v24  ;;  %v188_v45 = vld [vmem:[%s407_s6] ss:$0 sm:$0xff] }
  0x16   :  { %104 = vmatpush.msra.mxu1 %v85_v12 }
  0x17   :  { %142 = vmatpush.msra.mxu2 %v129_v25 }
  0x18   :  { %105 = vmatpush.msra.mxu1 %v84_v13 }
  0x19   :  { %143 = vmatpush.msra.mxu2 %v128_v26 }
  0x1a   :  { %106 = vmatpush.msra.mxu1 %v83_v14 }
  0x1b   :  { %144 = vmatpush.msra.mxu2 %v127_v27 }
  0x1c   :  { %107 = vmatpush.msra.mxu1 %v82_v15 }
  0x1d   :  { %145 = vmatpush.msra.mxu2 %v126_v28 }
  0x1e   :  { %108 = vmatpush.msra.mxu1 %v81_v16 }
  0x1f   :  { %146 = vmatpush.msra.mxu2 %v125_v29 }
  0x20   :  { %109 = vmatpush.msra.mxu1 %v80_v17 }
  0x21   :  { %147 = vmatpush.msra.mxu2 %v124_v30 }
  0x22   :  { %110 = vmatpush.msra.mxu1 %v79_v18 }
  0x23   :  { %148 = vmatpush.msra.mxu2 %v123_v31 }
  0x24   :  { %111 = vmatpush.msra.mxu1 %v78_v19 }
  0x25   :  { %149 = vmatpush.msra.mxu2 %v122_v32 }
  0x26   :  { %112 = vmatpush.msra.mxu1 %v77_v20 }
  0x27   :  { %150 = vmatpush.msra.mxu2 %v121_v33 }
  0x29   :  { %151 = vmatpush.msra.mxu2 %v120_v38 }
  0x2b   :  { %152 = vmatpush.msra.mxu2 %v119_v39 }
  0x2d   :  { %153 = vmatpush.msra.mxu2 %v118_v40 }
  0x8b   :  { %v73_v35 = vpop.f32.mrf.mxu0 }
  0x8c   :  { %v74_v36 = vadd.f32 %v186_v34, %v73_v35 }
  0x8e   :  { %v76_v37 = vmax.f32 %v74_v36, 0.0 }
  0x90   :  { %113 = vmatmul.f32.vlgmr.msra.gmra.mxu1 %v76_v37 }
 0x10d   :  { %v114_v42 = vpop.f32.mrf.mxu1 }
 0x10e   :  { %v115_v43 = vadd.f32 %v187_v41, %v114_v42 }
 0x110   :  { %v117_v44 = vmax.f32 %v115_v43, 0.0 }
 0x112   :  { %154 = vmatmul.f32.vlgmr.msra.gmra.mxu2 %v117_v44 }
 0x195   :  { %v155_v46 = vpop.f32.mrf.mxu2 }
 0x196   :  { %v156_v47 = vadd.f32 %v188_v45, %v155_v46 }
 0x198   :  { %159 = vst.msk [vmem:[#allocation5] sm:$0xff] %vm158_vm1, %v156_v47 }
 0x199   :  { %163 = vsyncadd [#allocation4], 112  ;;  %s166_s26 = sshll.u32 %s408_s7, 4  ;;  %s244_s27 = smov [#allocation5]   ;;  %s167_s26 = int_to_ptr.hbm [resolvable:$true] %s166_s26 }
 0x19a   :  { %s164_s28 = sshll.u32 %s244_s27, 4  ;;  %s245_s4 = smov 16   ;;  %s165_s28 = int_to_ptr.vmem [resolvable:$true] %s164_s28 }
 0x19b   :  { %s246_s29 = smov 1  }
 0x19c   :  { %172 = dma.vmem_to_hbm [thread:$0]  %s165_s28, 16, %s167_s26, [#allocation4], %s245_s4, %s245_s4, %s246_s29  }
 0x19d   :  { %239 = dma.done.wait [#allocation4], 128  }
 0x19e   :  { %240 = vsyncadd [#allocation4], 4294967168 }
 0x19f   :  { %177 = vsyncpa [#allocation3], 1 }
 0x1a0   :  { %178 = vsyncpa [#allocation4], 1 }

</bundles_post_ra>
